<compile_context>
chip_gen: v7x
topology: tpu7x:2x2x1
jax: 0.10.0
libtpu: 0.0.40
codegen_flags: <defaults>
</compile_context>

<pallas_src>
import functools

import jax
import jax.numpy as jnp
from jax.experimental import pallas as pl
from jax.experimental.pallas import tpu as pltpu


_EPS = 1e-5        # LayerNorm / BatchNorm eps (PyTorch default)
_TILE_M = 512      # rows per grid step for M-tiled kernels

_PARALLEL = pltpu.CompilerParams(dimension_semantics=("parallel",))
_ARBITRARY = pltpu.CompilerParams(dimension_semantics=("arbitrary",))


def _dot(a, b):
    """MXU matmul: bf16 operands, f32 accumulation."""
    return jnp.dot(a.astype(jnp.bfloat16), b.astype(jnp.bfloat16),
                   preferred_element_type=jnp.float32)


def _tile_rows(m):
    return m if m <= _TILE_M else _TILE_M


# ----------------------------------------------------------------------------
# Pallas kernels
# ----------------------------------------------------------------------------
def _mm_kernel(relu, x_ref, w_ref, b_ref, o_ref):
    y = _dot(x_ref[...], w_ref[...]) + b_ref[...]
    if relu:
        y = jnp.maximum(y, 0.0)
    o_ref[...] = y


def matmul_bias(x, w, b, relu=False):
    """x: [M, K], w: [K, N], b: [N] -> [M, N] (optionally ReLU). M-tiled."""
    M, K = x.shape
    N = w.shape[1]
    tm = _tile_rows(M)
    return pl.pallas_call(
        functools.partial(_mm_kernel, relu),
        out_shape=jax.ShapeDtypeStruct((M, N), jnp.float32),
        grid=(pl.cdiv(M, tm),),
        in_specs=[
            pl.BlockSpec((tm, K), lambda i: (i, 0)),
            pl.BlockSpec((K, N), lambda i: (0, 0)),
            pl.BlockSpec((1, N), lambda i: (0, 0)),
        ],
        out_specs=pl.BlockSpec((tm, N), lambda i: (i, 0)),
        compiler_params=_PARALLEL,
    )(x, w, b.reshape(1, N))


def _ln_mm_kernel(x_ref, g_ref, b_ref, w_ref, bias_ref, o_ref):
    x = x_ref[...]
    mu = jnp.mean(x, axis=-1, keepdims=True)
    var = jnp.mean((x - mu) ** 2, axis=-1, keepdims=True)
    xn = (x - mu) * jax.lax.rsqrt(var + _EPS) * g_ref[...] + b_ref[...]
    o_ref[...] = _dot(xn, w_ref[...]) + bias_ref[...]


def ln_conv1x1(x, g, b, w, bias):
    """Fused LayerNorm(channel) + pointwise Conv1d. x: [B, T, Cin]."""
    B, T, Cin = x.shape
    Cout = w.shape[1]
    M = B * T
    tm = _tile_rows(M)
    out = pl.pallas_call(
        _ln_mm_kernel,
        out_shape=jax.ShapeDtypeStruct((M, Cout), jnp.float32),
        grid=(pl.cdiv(M, tm),),
        in_specs=[
            pl.BlockSpec((tm, Cin), lambda i: (i, 0)),
            pl.BlockSpec((1, Cin), lambda i: (0, 0)),
            pl.BlockSpec((1, Cin), lambda i: (0, 0)),
            pl.BlockSpec((Cin, Cout), lambda i: (0, 0)),
            pl.BlockSpec((1, Cout), lambda i: (0, 0)),
        ],
        out_specs=pl.BlockSpec((tm, Cout), lambda i: (i, 0)),
        compiler_params=_PARALLEL,
    )(x.reshape(M, Cin), g.reshape(1, Cin), b.reshape(1, Cin), w,
      bias.reshape(1, Cout))
    return out.reshape(B, T, Cout)


def _mask_kernel(x_ref, y_ref, w_ref, b_ref, o_ref):
    m = jnp.maximum(_dot(y_ref[...], w_ref[...]) + b_ref[...], 0.0)
    o_ref[...] = x_ref[...] * m


def mask_apply(x_enc, y, w, b):
    """Fused (3 mask convs + ReLU + elementwise multiply).
    x_enc: [B, T, 3C], y: [B, T, C], w: [C, 3C], b: [3C] -> [B, T, 3C]."""
    B, T, C3 = x_enc.shape
    C = y.shape[-1]
    M = B * T
    tm = _tile_rows(M)
    out = pl.pallas_call(
        _mask_kernel,
        out_shape=jax.ShapeDtypeStruct((M, C3), jnp.float32),
        grid=(pl.cdiv(M, tm),),
        in_specs=[
            pl.BlockSpec((tm, C3), lambda i: (i, 0)),
            pl.BlockSpec((tm, C), lambda i: (i, 0)),
            pl.BlockSpec((C, C3), lambda i: (0, 0)),
            pl.BlockSpec((1, C3), lambda i: (0, 0)),
        ],
        out_specs=pl.BlockSpec((tm, C3), lambda i: (i, 0)),
        compiler_params=_PARALLEL,
    )(x_enc.reshape(M, C3), y.reshape(M, C), w, b.reshape(1, C3))
    return out.reshape(B, T, C3)


def _tcn_kernel(dilation, C, has_ref, *refs):
    """One full TCN block per grid step (one batch element)."""
    if has_ref:
        (y_ref, ref_ref, w_in_ref, b_in_ref, a1_ref, n1g_ref, n1b_ref,
         wd_ref, bd_ref, a2_ref, n2g_ref, n2b_ref, wo_ref, bo_ref, o_ref) = refs
    else:
        (y_ref, w_in_ref, b_in_ref, a1_ref, n1g_ref, n1b_ref,
         wd_ref, bd_ref, a2_ref, n2g_ref, n2b_ref, wo_ref, bo_ref, o_ref) = refs

    y = y_ref[0]                                     # [T, C]
    w_in = w_in_ref[...]                             # [C(+O), H]
    h = _dot(y, w_in[:C])
    if has_ref:
        # ref contribution is constant over time -> [1, H] broadcast.
        h = h + _dot(ref_ref[0], w_in[C:])
    h = h + b_in_ref[...]

    h = jnp.where(h >= 0.0, h, h * a1_ref[0])        # PReLU
    mu = jnp.mean(h, axis=-1, keepdims=True)
    var = jnp.mean((h - mu) ** 2, axis=-1, keepdims=True)
    h = (h - mu) * jax.lax.rsqrt(var + _EPS) * n1g_ref[...] + n1b_ref[...]

    # Depthwise dilated conv (kernel=3, 'same' zero padding).  The +/-d time
    # shifts are XLU sublane rotations + iota masks -- no T x T shift-matrix
    # matmul and no T x T iota buffer in VMEM.
    T = h.shape[0]
    if dilation < T:
        row = jax.lax.broadcasted_iota(jnp.int32, h.shape, 0)
        hm = jnp.where(row >= dilation,
                       pltpu.roll(h, dilation, axis=0), 0.0)        # h[t - d]
        hp = jnp.where(row < T - dilation,
                       pltpu.roll(h, T - dilation, axis=0), 0.0)    # h[t + d]
    else:
        hm = jnp.zeros_like(h)
        hp = jnp.zeros_like(h)
    wd = wd_ref[...]                                 # [3, H]
    h = hm * wd[0] + h * wd[1] + hp * wd[2] + bd_ref[...]

    h = jnp.where(h >= 0.0, h, h * a2_ref[0])        # PReLU
    mu = jnp.mean(h, axis=-1, keepdims=True)
    var = jnp.mean((h - mu) ** 2, axis=-1, keepdims=True)
    h = (h - mu) * jax.lax.rsqrt(var + _EPS) * n2g_ref[...] + n2b_ref[...]

    o_ref[0] = y + _dot(h, wo_ref[...]) + bo_ref[...]


def tcn_block(p, y, ref_vec=None):
    """Fused TCN block. y: [B, T, C]; ref_vec: [B, O] (first block of a stack)."""
    B, T, C = y.shape
    H = p["b_in"].shape[0]
    has_ref = ref_vec is not None

    smem = pl.BlockSpec(memory_space=pltpu.MemorySpace.SMEM)
    inputs = [y]
    specs = [pl.BlockSpec((1, T, C), lambda b: (b, 0, 0))]
    if has_ref:
        O = ref_vec.shape[-1]
        inputs.append(ref_vec.reshape(B, 1, O))
        specs.append(pl.BlockSpec((1, 1, O), lambda b: (b, 0, 0)))

    inputs += [p["w_in"], p["b_in"].reshape(1, H), p["a1"],
               p["n1_g"].reshape(1, H), p["n1_b"].reshape(1, H),
               p["w_d"], p["b_d"].reshape(1, H), p["a2"],
               p["n2_g"].reshape(1, H), p["n2_b"].reshape(1, H),
               p["w_out"], p["b_out"].reshape(1, C)]
    specs += [
        pl.BlockSpec(p["w_in"].shape, lambda b: (0, 0)),
        pl.BlockSpec((1, H), lambda b: (0, 0)),
        smem,
        pl.BlockSpec((1, H), lambda b: (0, 0)),
        pl.BlockSpec((1, H), lambda b: (0, 0)),
        pl.BlockSpec((3, H), lambda b: (0, 0)),
        pl.BlockSpec((1, H), lambda b: (0, 0)),
        smem,
        pl.BlockSpec((1, H), lambda b: (0, 0)),
        pl.BlockSpec((1, H), lambda b: (0, 0)),
        pl.BlockSpec((H, C), lambda b: (0, 0)),
        pl.BlockSpec((1, C), lambda b: (0, 0)),
    ]

    return pl.pallas_call(
        functools.partial(_tcn_kernel, int(p["dilation"]), C, has_ref),
        out_shape=jax.ShapeDtypeStruct((B, T, C), jnp.float32),
        grid=(B,),
        in_specs=specs,
        out_specs=pl.BlockSpec((1, T, C), lambda b: (b, 0, 0)),
        compiler_params=_PARALLEL,
    )(*inputs)


def _resnet_kernel(has_down, *refs):
    if has_down:
        (x_ref, w1_ref, b1_ref, g1_ref, be1_ref, a1_ref,
         w2_ref, b2_ref, g2_ref, be2_ref, a2_ref, wd_ref, bd_ref, o_ref) = refs
    else:
        (x_ref, w1_ref, b1_ref, g1_ref, be1_ref, a1_ref,
         w2_ref, b2_ref, g2_ref, be2_ref, a2_ref, o_ref) = refs

    x = x_ref[...]
    y = _dot(x, w1_ref[...]) + b1_ref[...]
    mu = jnp.mean(y, axis=0, keepdims=True)
    var = jnp.mean((y - mu) ** 2, axis=0, keepdims=True)
    y = (y - mu) * jax.lax.rsqrt(var + _EPS) * g1_ref[...] + be1_ref[...]
    y = jnp.where(y >= 0.0, y, y * a1_ref[0])

    y = _dot(y, w2_ref[...]) + b2_ref[...]
    mu = jnp.mean(y, axis=0, keepdims=True)
    var = jnp.mean((y - mu) ** 2, axis=0, keepdims=True)
    y = (y - mu) * jax.lax.rsqrt(var + _EPS) * g2_ref[...] + be2_ref[...]

    res = (_dot(x, wd_ref[...]) + bd_ref[...]) if has_down else x
    y = y + res
    o_ref[...] = jnp.where(y >= 0.0, y, y * a2_ref[0])


def resnet_block(p, x):
    """Fused (conv1x1 + BN + PReLU + conv1x1 + BN + downsample + residual +
    PReLU) as one kernel; MaxPool1d(3) as glue.  x: [B, T, Cin]."""
    # TODO(synk): BatchNorm uses batch statistics over the whole block
    # (grid=(1,)); very long reference audio would need a two-pass reduction.
    B, T, Cin = x.shape
    Cout = p["w1"].shape[1]
    M = B * T
    has_down = "wd" in p
    smem = pl.BlockSpec(memory_space=pltpu.MemorySpace.SMEM)

    inputs = [x.reshape(M, Cin), p["w1"], p["b1"].reshape(1, Cout),
              p["bn1_g"].reshape(1, Cout), p["bn1_b"].reshape(1, Cout), p["a1"],
              p["w2"], p["b2"].reshape(1, Cout),
              p["bn2_g"].reshape(1, Cout), p["bn2_b"].reshape(1, Cout), p["a2"]]
    specs = [pl.BlockSpec((M, Cin), lambda i: (0, 0)),
             pl.BlockSpec((Cin, Cout), lambda i: (0, 0)),
             pl.BlockSpec((1, Cout), lambda i: (0, 0)),
             pl.BlockSpec((1, Cout), lambda i: (0, 0)),
             pl.BlockSpec((1, Cout), lambda i: (0, 0)),
             smem,
             pl.BlockSpec((Cout, Cout), lambda i: (0, 0)),
             pl.BlockSpec((1, Cout), lambda i: (0, 0)),
             pl.BlockSpec((1, Cout), lambda i: (0, 0)),
             pl.BlockSpec((1, Cout), lambda i: (0, 0)),
             smem]
    if has_down:
        inputs += [p["wd"], p["bd"].reshape(1, Cout)]
        specs += [pl.BlockSpec((Cin, Cout), lambda i: (0, 0)),
                  pl.BlockSpec((1, Cout), lambda i: (0, 0))]

    y = pl.pallas_call(
        functools.partial(_resnet_kernel, has_down),
        out_shape=jax.ShapeDtypeStruct((M, Cout), jnp.float32),
        grid=(1,),
        in_specs=specs,
        out_specs=pl.BlockSpec((M, Cout), lambda i: (0, 0)),
        compiler_params=_ARBITRARY,
    )(*inputs)
    return maxpool3(y.reshape(B, T, Cout))


def _mean_time_kernel(inv_t, x_ref, o_ref):
    o_ref[...] = jnp.sum(x_ref[...], axis=1) * inv_t


def mean_time(x):
    """Mean over the time axis. x: [B, T, C] -> [B, C]."""
    B, T, C = x.shape
    return pl.pallas_call(
        functools.partial(_mean_time_kernel, 1.0 / T),
        out_shape=jax.ShapeDtypeStruct((B, C), jnp.float32),
        grid=(1,),
        in_specs=[pl.BlockSpec((B, T, C), lambda i: (0, 0, 0))],
        out_specs=pl.BlockSpec((B, C), lambda i: (0, 0)),
        compiler_params=_ARBITRARY,
    )(x)


# ----------------------------------------------------------------------------
# JAX glue helpers
# ----------------------------------------------------------------------------
def maxpool3(x):
    """nn.MaxPool1d(3) along time. x: [B, T, C]."""
    B, T, C = x.shape
    n = (T - 3) // 3 + 1
    return x[:, : n * 3, :].reshape(B, n, 3, C).max(axis=2)


# ----------------------------------------------------------------------------
# Model sub-modules
# ----------------------------------------------------------------------------
def speech_encoder(p, x, cfg):
    """All three encoder banks as ONE framing + ONE [Kl, 3C] matmul."""
    Ks, Km, Kl = cfg["short_kernel"], cfg["middle_kernel"], cfg["long_kernel"]
    S = Ks // 2
    init_len = x.shape[-1]
    rem = (init_len - Ks) % S
    if rem != 0:
        x = jnp.pad(x, ((0, 0), (0, S - rem)))
    Lp = x.shape[-1]
    T = (Lp - Ks) // S + 1
    need = (T - 1) * S + Kl                    # covers the long kernel taps
    xl = jnp.pad(x, ((0, 0), (0, need - Lp)))
    # TODO(synk): im2col framing done with an XLA gather; an in-kernel framing
    # with pl.ds would avoid the intermediate [B, T, Kl] buffer.
    idx = jnp.arange(T)[:, None] * S + jnp.arange(Kl)[None, :]
    frames = xl[:, idx]                        # [B, T, Kl]
    B = x.shape[0]
    C3 = p["b_enc"].shape[0]
    y = matmul_bias(frames.reshape(B * T, Kl), p["w_enc"], p["b_enc"],
                    relu=True)
    return y.reshape(B, T, C3), init_len


def speaker_encoder(p, x):
    """x: [B, T, 3C] -> (ref_vec [B, O], logits [B, n_speakers])."""
    y = ln_conv1x1(x, p["ln_g"], p["ln_b"], p["w1"], p["b1"])
    for bp in p["blocks"]:
        y = resnet_block(bp, y)
    B, T, O = y.shape[0], y.shape[1], p["w2"].shape[1]
    y = matmul_bias(y.reshape(B * T, y.shape[-1]), p["w2"], p["b2"])
    y = y.reshape(B, T, O)
    ref_vec = mean_time(y)
    logits = matmul_bias(ref_vec, p["w_lin"], p["b_lin"])
    return ref_vec, logits


def speaker_extractor(p, x, ref_vec, cfg):
    """x: [B, T, 3C], ref_vec: [B, O] -> combined encs [B, T, 3C]."""
    y = ln_conv1x1(x, p["ln_g"], p["ln_b"], p["w1"], p["b1"])
    for stack in p["stacks"]:
        for j, bp in enumerate(stack):
            y = tcn_block(bp, y, ref_vec if j == 0 else None)
    return mask_apply(x, y, p["w_mask"], p["b_mask"])


def speech_decoder(p, e, init_len, cfg):
    """e: [B, T, 3C] -> (s1, s2, s3).  One block-diagonal matmul, then
    per-branch overlap-add (JAX scatter-add glue)."""
    Ks, Km, Kl = cfg["short_kernel"], cfg["middle_kernel"], cfg["long_kernel"]
    S = Ks // 2
    B, T, C3 = e.shape
    Ktot = Ks + Km + Kl
    frames = matmul_bias(e.reshape(B * T, C3), p["w_dec"],
                         jnp.zeros((Ktot,), jnp.float32))
    frames = frames.reshape(B, T, Ktot)

    def overlap_add(fr, K, bias):
        out_len = (T - 1) * S + K
        idx = jnp.arange(T)[:, None] * S + jnp.arange(K)[None, :]
        out = jnp.zeros((B, out_len), jnp.float32).at[:, idx].add(fr)
        return (out + bias)[:, :init_len]

    s1 = overlap_add(frames[..., :Ks], Ks, p["b_s"])
    s2 = overlap_add(frames[..., Ks:Ks + Km], Km, p["b_m"])
    s3 = overlap_add(frames[..., Ks + Km:], Kl, p["b_l"])
    return s1, s2, s3


def spexplus_forward(params, x, ref, cfg):
    """Matches SpexPlus.forward(x, ref, have_relevant_speakers=True)."""
    if x.shape == ref.shape:
        both, _ = speech_encoder(params["enc"],
                                 jnp.concatenate([x, ref], axis=0), cfg)
        mix_encs, ref_encs = both[: x.shape[0]], both[x.shape[0]:]
        mix_init_len = x.shape[-1]
    else:
        mix_encs, mix_init_len = speech_encoder(params["enc"], x, cfg)
        ref_encs, _ = speech_encoder(params["enc"], ref, cfg)
    ref_vec, speaker_logits = speaker_encoder(params["spk"], ref_encs)
    ref_vec = jnp.tile(ref_vec, (x.shape[0] // ref_vec.shape[0], 1))
    e = speaker_extractor(params["ext"], mix_encs, ref_vec, cfg)
    s1, s2, s3 = speech_decoder(params["dec"], e, mix_init_len, cfg)
    return s1, s2, s3, speaker_logits


# ----------------------------------------------------------------------------
# Deterministic parameter initialization
# ----------------------------------------------------------------------------
class KeyGen:
    def __init__(self, seed):
        self.key = jax.random.PRNGKey(seed)

    def __call__(self):
        self.key, sub = jax.random.split(self.key)
        return sub


def init_params(kg, cfg):
    C = cfg["n_channels"]
    H = cfg["hidden_channels"]
    O = cfg["out_channels"]
    Ks, Km, Kl = cfg["short_kernel"], cfg["middle_kernel"], cfg["long_kernel"]
    nR, nSpk = cfg["n_resnetblocks"], cfg["n_speakers"]
    nStack, nTcn = cfg["n_stacked_tcnblocks"], cfg["n_tcnblocks"]

    def w(shape):
        return jax.random.normal(kg(), shape, jnp.float32) * 0.1

    zeros = lambda s: jnp.zeros(s, jnp.float32)
    ones = lambda s: jnp.ones(s, jnp.float32)
    alpha = lambda: jnp.full((1,), 0.25, jnp.float32)

    # Encoder: three banks fused into a single lane-dense [Kl, 3C] weight
    # (short/middle weights zero-padded along the tap axis).
    w_s, w_m, w_l = w((Ks, C)), w((Km, C)), w((Kl, C))
    w_enc = jnp.concatenate([
        jnp.pad(w_s, ((0, Kl - Ks), (0, 0))),
        jnp.pad(w_m, ((0, Kl - Km), (0, 0))),
        w_l], axis=1)
    enc = dict(w_enc=w_enc, b_enc=zeros((3 * C,)))

    def resnet_params(cin, cout):
        p = dict(w1=w((cin, cout)), b1=zeros((cout,)),
                 bn1_g=ones((cout,)), bn1_b=zeros((cout,)), a1=alpha(),
                 w2=w((cout, cout)), b2=zeros((cout,)),
                 bn2_g=ones((cout,)), bn2_b=zeros((cout,)), a2=alpha())
        if cin != cout:
            p["wd"] = w((cin, cout))
            p["bd"] = zeros((cout,))
        return p

    res_dims = [(C, C)] * (nR // 2) + [(C, O)] + [(O, O)] * (nR - nR // 2 - 1)
    spk = dict(ln_g=ones((3 * C,)), ln_b=zeros((3 * C,)),
               w1=w((3 * C, C)), b1=zeros((C,)),
               blocks=[resnet_params(a, b) for a, b in res_dims],
               w2=w((O, O)), b2=zeros((O,)),
               w_lin=w((O, nSpk)), b_lin=zeros((nSpk,)))

    def tcn_params(cin, dilation, ref_dim=0):
        return dict(w_in=w((cin + ref_dim, H)), b_in=zeros((H,)),
                    a1=alpha(), n1_g=ones((H,)), n1_b=zeros((H,)),
                    w_d=w((3, H)), b_d=zeros((H,)),
                    a2=alpha(), n2_g=ones((H,)), n2_b=zeros((H,)),
                    w_out=w((H, C)), b_out=zeros((C,)),
                    dilation=int(dilation))

    stacks = []
    for _ in range(nStack):
        stack = [tcn_params(C, 1, ref_dim=O)]
        for i in range(1, nTcn):
            stack.append(tcn_params(C, 2 ** i))
        stacks.append(stack)

    # Masks: the three 1x1 convs fused into one [C, 3C] weight.
    ext = dict(ln_g=ones((3 * C,)), ln_b=zeros((3 * C,)),
               w1=w((3 * C, C)), b1=zeros((C,)),
               stacks=stacks,
               w_mask=w((C, 3 * C)), b_mask=zeros((3 * C,)))

    # Decoders: block-diagonal [3C, Ks+Km+Kl] weight (lane-dense output).
    w_ds, w_dm, w_dl = w((C, Ks)), w((C, Km)), w((C, Kl))
    Ktot = Ks + Km + Kl
    w_dec = jnp.zeros((3 * C, Ktot), jnp.float32)
    w_dec = w_dec.at[0:C, 0:Ks].set(w_ds)
    w_dec = w_dec.at[C:2 * C, Ks:Ks + Km].set(w_dm)
    w_dec = w_dec.at[2 * C:, Ks + Km:].set(w_dl)
    dec = dict(w_dec=w_dec, b_s=jnp.float32(0.0), b_m=jnp.float32(0.0),
               b_l=jnp.float32(0.0))

    return dict(enc=enc, spk=spk, ext=ext, dec=dec)


# ----------------------------------------------------------------------------
# Main
# ----------------------------------------------------------------------------
if __name__ == "__main__":
    cfg = dict(n_channels=16, hidden_channels=24, out_channels=32,
               short_kernel=20, middle_kernel=40, long_kernel=80,
               n_resnetblocks=3, n_speakers=10,
               n_stacked_tcnblocks=1, n_tcnblocks=3, causal=False)

    params = init_params(KeyGen(42), cfg)

    key = jax.random.PRNGKey(0)
    k1, k2 = jax.random.split(key)
    x = jax.random.normal(k1, (2, 330), jnp.float32)    # mixture waveforms
    ref = jax.random.normal(k2, (2, 330), jnp.float32)  # reference waveforms

    s1, s2, s3, logits = spexplus_forward(params, x, ref, cfg)
    jax.block_until_ready((s1, s2, s3, logits))

    assert s1.shape == (2, 330) and s2.shape == (2, 330) and s3.shape == (2, 330)
    assert logits.shape == (2, cfg["n_speakers"])
    print("KERNEL_OK")
</pallas_src>

<mosaic_0001>
module attributes {stable_mosaic.version = 11 : i64} {
  func.func @_mm_kernel(%arg0: i32, %arg1: memref<128x80xf32, #tpu.memory_space<vmem>>, %arg2: memref<80x48xf32, #tpu.memory_space<vmem>>, %arg3: memref<1x48xf32, #tpu.memory_space<vmem>>, %arg4: memref<128x48xf32, #tpu.memory_space<vmem>>) attributes {dimension_semantics = [#tpu.dimension_semantics<parallel>], iteration_bounds = array<i64: 1>, scalar_prefetch = 0 : i64, scratch_operands = 0 : i64, tpu.core_type = #tpu.core_type<tc>, window_params = [{transform_indices = @transform_0, window_bounds = array<i64: 128, 80>}, {pipeline_mode = #tpu.pipeline_mode<synchronous>, transform_indices = @transform_1, window_bounds = array<i64: 80, 48>}, {pipeline_mode = #tpu.pipeline_mode<synchronous>, transform_indices = @transform_2, window_bounds = array<i64: 1, 48>}, {transform_indices = @transform_3, window_bounds = array<i64: 128, 48>}]} {
    %c0 = arith.constant 0 : index
    %c0_0 = arith.constant 0 : index
    %0 = vector.load %arg1[%c0, %c0_0] : memref<128x80xf32, #tpu.memory_space<vmem>>, vector<128x80xf32>
    %c0_1 = arith.constant 0 : index
    %c0_2 = arith.constant 0 : index
    %1 = vector.load %arg2[%c0_1, %c0_2] : memref<80x48xf32, #tpu.memory_space<vmem>>, vector<80x48xf32>
    %2 = arith.truncf %0 : vector<128x80xf32> to vector<128x80xbf16>
    %3 = arith.truncf %1 : vector<80x48xf32> to vector<80x48xbf16>
    %cst = arith.constant dense<0.000000e+00> : vector<128x48xf32>
    %4 = tpu.matmul %2, %3, %cst {dimension_numbers = #tpu.dot_dimension_numbers<[1], [0], [0], [1], [0, 0, 1, 1], [], []>} : vector<128x80xbf16>, vector<80x48xbf16>, vector<128x48xf32> -> vector<128x48xf32>
    %c0_3 = arith.constant 0 : index
    %c0_4 = arith.constant 0 : index
    %5 = vector.load %arg3[%c0_3, %c0_4] : memref<1x48xf32, #tpu.memory_space<vmem>>, vector<1x48xf32>
    %6 = vector.broadcast %5 : vector<1x48xf32> to vector<128x48xf32>
    %7 = arith.addf %4, %6 : vector<128x48xf32>
    %cst_5 = arith.constant 0.000000e+00 : f32
    %8 = vector.broadcast %cst_5 : f32 to vector<128x48xf32>
    %9 = arith.maximumf %7, %8 : vector<128x48xf32>
    %c0_6 = arith.constant 0 : index
    %c0_7 = arith.constant 0 : index
    %10 = vector.load %arg4[%c0_6, %c0_7] : memref<128x48xf32, #tpu.memory_space<vmem>>, vector<128x48xf32>
    tpu.vector_store %arg4[%c0_6, %c0_7], %9 {strides = array<i32>} : memref<128x48xf32, #tpu.memory_space<vmem>>, vector<128x48xf32>,
    return
  }
  func.func @transform_0(%arg0: i32) -> (i32, i32) {
    %c0_i32 = arith.constant 0 : i32
    %c0_i32_0 = arith.constant 0 : i32
    return %arg0, %c0_i32 : i32, i32
  }
  func.func @transform_1(%arg0: i32) -> (i32, i32) {
    %c0_i32 = arith.constant 0 : i32
    %c0_i32_0 = arith.constant 0 : i32
    %c0_i32_1 = arith.constant 0 : i32
    return %c0_i32, %c0_i32_0 : i32, i32
  }
  func.func @transform_2(%arg0: i32) -> (i32, i32) {
    %c0_i32 = arith.constant 0 : i32
    %c0_i32_0 = arith.constant 0 : i32
    %c0_i32_1 = arith.constant 0 : i32
    return %c0_i32, %c0_i32_0 : i32, i32
  }
  func.func @transform_3(%arg0: i32) -> (i32, i32) {
    %c0_i32 = arith.constant 0 : i32
    %c0_i32_0 = arith.constant 0 : i32
    return %arg0, %c0_i32 : i32, i32
  }
}

</mosaic_0001>

<bundles_post_ra>
// kernel: tpu_custom_call.1
= control target key start
LH: loop header
LB: loop body
LE: loop exit
PB: predicated region body
PF: predicated region fallthrough
CT: control target
= control target key end

     0   :  { %vm61_vm0 = vcmask 654336   ;;  %vm199_vm1 = vcmask 392192   ;;  %s451_s1 = inlined_call_operand.vmem [shape: f32[80,48], index: 1, kind: input, shape index: {}]   ;;  %s452_s0 = inlined_call_operand.vmem [shape: f32[128,80], index: 0, kind: input, shape index: {}]   ;;  %s453_s2 = inlined_call_operand.vmem [shape: f32[1,48], index: 2, kind: input, shape index: {}]   ;;  %s454_s3 = inlined_call_operand.vmem [shape: f32[128,48], index: 3, kind: output, shape index: {}]  }
   0x1   :  { %v31_v0 = vld [vmem:[%s451_s1] sm:$0xff]  ;;  %v32_v1 = vld [vmem:[%s451_s1 + $0x8] sm:$0xff]  ;;  %v33_v2 = vld [vmem:[%s451_s1 + $0x10] sm:$0xff] }
   0x2   :  { %v49_v3 = vpack.c.bf16 %v32_v1, %v31_v0  ;;  %v34_v4 = vld [vmem:[%s451_s1 + $0x18] sm:$0xff]  ;;  %v35_v6 = vld [vmem:[%s451_s1 + $0x20] sm:$0xff]  ;;  %v36_v7 = vld [vmem:[%s451_s1 + $0x28] sm:$0xff] }
   0x3   :  { %v50_v5 = vpack.c.bf16 %v34_v4, %v33_v2  ;;  %v15_v8 = vld [vmem:[%s452_s0] sm:$0xff]  ;;  %v16_v9 = vld [vmem:[%s452_s0 + $0x8] sm:$0xff]  ;;  %v51_v13 = vpack.c.bf16 %v36_v7, %v35_v6  ;;  %v37_v15 = vld [vmem:[%s451_s1 + $0x30] sm:$0xff] }
   0x4   :  { %242 = vmatprep.subr.bf16.mxu0 %v49_v3  ;;  %268 = vmatprep.subr.bf16.mxu1 %v49_v3  ;;  %v41_v10 = vpack.c.bf16 %v16_v9, %v15_v8  ;;  %v23_v11 = vld [vmem:[%s452_s0 + $0x40] sm:$0xff]  ;;  %v24_v12 = vld [vmem:[%s452_s0 + $0x48] sm:$0xff]  ;;  %v38_v16 = vld [vmem:[%s451_s1 + $0x38] sm:$0xff] }
   0x5   :  { %243 = vmatpush3.bf16.msra.mxu0 %v49_v3  ;;  %273 = vmatpush3.bf16.msra.mxu1 %v49_v3  ;;  %v45_v14 = vpack.c.bf16 %v24_v12, %v23_v11  ;;  %v52_v17 = vpack.c.bf16 %v38_v16, %v37_v15  ;;  %v39_v18 = vld [vmem:[%s451_s1 + $0x40] sm:$0xff]  ;;  %v40_v19 = vld [vmem:[%s451_s1 + $0x48] sm:$0xff]  ;;  %v17_v21 = vld [vmem:[%s452_s0 + $0x10] sm:$0xff] }
   0x6   :  { %244 = vmatprep.subr.bf16.mxu0 %v50_v5  ;;  %269 = vmatprep.subr.bf16.mxu1 %v50_v5  ;;  %v53_v20 = vpack.c.bf16 %v40_v19, %v39_v18  ;;  %v18_v22 = vld [vmem:[%s452_s0 + $0x18] sm:$0xff]  ;;  %v25_v23 = vld [vmem:[%s452_s0 + $0x50] sm:$0xff]  ;;  %v19_v25 = vld [vmem:[%s452_s0 + $0x20] sm:$0xff] }
   0x7   :  { %252 = vmatprep.mubr.msk.bf16.mxu0 %vm61_vm0, %v41_v10  ;;  %260 = vmatprep.mubr.msk.bf16.mxu1 %vm61_vm0, %v45_v14  ;;  %v26_v24 = vld [vmem:[%s452_s0 + $0x58] sm:$0xff]  ;;  %v20_v26 = vld [vmem:[%s452_s0 + $0x28] sm:$0xff]  ;;  %v27_v27 = vld [vmem:[%s452_s0 + $0x60] sm:$0xff]  ;;  %v42_v29 = vpack.c.bf16 %v18_v22, %v17_v21 }
   0x8   :  { %v28_v28 = vld [vmem:[%s452_s0 + $0x68] sm:$0xff]  ;;  %v46_v30 = vpack.c.bf16 %v26_v24, %v25_v23  ;;  %v43_v31 = vpack.c.bf16 %v20_v26, %v19_v25  ;;  %v21_v33 = vld [vmem:[%s452_s0 + $0x30] sm:$0xff]  ;;  %v22_v34 = vld [vmem:[%s452_s0 + $0x38] sm:$0xff] }
   0x9   :  { %245 = vmatpush3.bf16.msra.mxu0 %v50_v5  ;;  %274 = vmatpush3.bf16.msra.mxu1 %v50_v5  ;;  %v47_v32 = vpack.c.bf16 %v28_v28, %v27_v27  ;;  %v29_v35 = vld [vmem:[%s452_s0 + $0x70] sm:$0xff]  ;;  %v30_v36 = vld [vmem:[%s452_s0 + $0x78] sm:$0xff]  ;;  %v44_v37 = vpack.c.bf16 %v22_v34, %v21_v33  ;;  %v220_v39 = vld [vmem:[%s453_s2] ss:$0 sm:$0xff] }
   0xa   :  { %246 = vmatprep.subr.bf16.mxu0 %v51_v13  ;;  %270 = vmatprep.subr.bf16.mxu1 %v51_v13  ;;  %v48_v38 = vpack.c.bf16 %v30_v36, %v29_v35 }
   0xd   :  { %247 = vmatpush3.bf16.msra.mxu0 %v51_v13  ;;  %275 = vmatpush3.bf16.msra.mxu1 %v51_v13 }
   0xe   :  { %248 = vmatprep.subr.bf16.mxu0 %v52_v17  ;;  %271 = vmatprep.subr.bf16.mxu1 %v52_v17 }
  0x11   :  { %249 = vmatpush3.bf16.msra.mxu0 %v52_v17  ;;  %276 = vmatpush3.bf16.msra.mxu1 %v52_v17 }
  0x12   :  { %250 = vmatprep.subr.bf16.mxu0 %v53_v20  ;;  %272 = vmatprep.subr.bf16.mxu1 %v53_v20 }
  0x15   :  { %251 = vmatpush3.bf16.msra.mxu0 %v53_v20  ;;  %277 = vmatpush3.bf16.msra.mxu1 %v53_v20 }
  0x18   :  { %253 = vmatmul.mubr.msk.bf16.vlgmr.msra.gmra.mrb[0].mxu0 %vm61_vm0, %v42_v29  ;;  %261 = vmatmul.mubr.msk.bf16.vlgmr.msra.gmra.mrb[0].mxu1 %vm61_vm0, %v46_v30 }
  0x19   :  { %256 = vmatprep.mubr.msk.bf16.mxu0 %vm61_vm0, %v43_v31  ;;  %264 = vmatprep.mubr.msk.bf16.mxu1 %vm61_vm0, %v47_v32 }
  0x20   :  { %257 = vmatmul.mubr.msk.bf16.gmra.mrb[4].mxu0 %vm61_vm0, %v44_v37  ;;  %265 = vmatmul.mubr.msk.bf16.gmra.mrb[4].mxu1 %vm61_vm0, %v48_v38 }
  0xeb   :  { %v254_v40 = vpop.f32.mrb[0].mxu0  ;;  %v262_v41 = vpop.f32.mrb[0].mxu1 }
  0xec   :  { %v129_v42 = vadd.f32 %v254_v40, %v220_v39  ;;  %v161_v43 = vadd.f32 %v262_v41, %v220_v39  ;;  %v120_v44 = vpop.f32.mrb[1].mxu0  ;;  %v152_v45 = vpop.f32.mrb[1].mxu1 }
  0xed   :  { %v121_v46 = vadd.f32 %v220_v39, %v120_v44  ;;  %v153_v47 = vadd.f32 %v220_v39, %v152_v45  ;;  %v255_v48 = vpop.f32.mrb[2].mxu0  ;;  %v263_v49 = vpop.f32.mrb[2].mxu1 }
  0xee   :  { %v185_v50 = vmax.f32 %v129_v42, 0.0  ;;  %v193_v51 = vmax.f32 %v161_v43, 0.0  ;;  %v132_v52 = vadd.f32 %v255_v48, %v220_v39  ;;  %v164_v53 = vadd.f32 %v263_v49, %v220_v39  ;;  %v123_v54 = vpop.f32.mrb[3].mxu0  ;;  %v155_v55 = vpop.f32.mrb[3].mxu1 }
  0xef   :  { %v183_v56 = vmax.f32 %v121_v46, 0.0  ;;  %v191_v57 = vmax.f32 %v153_v47, 0.0  ;;  %v124_v58 = vadd.f32 %v220_v39, %v123_v54  ;;  %v156_v59 = vadd.f32 %v220_v39, %v155_v55 }
  0xf0   :  { %202 = vst.msk [vmem:[%s454_s3 + $0x10] sm:$0xff] %vm199_vm1, %v185_v50  ;;  %210 = vst.msk [vmem:[%s454_s3 + $0x50] sm:$0xff] %vm199_vm1, %v193_v51  ;;  %v186_v60 = vmax.f32 %v132_v52, 0.0  ;;  %v194_v61 = vmax.f32 %v164_v53, 0.0 }
  0xf1   :  { %200 = vst.msk [vmem:[%s454_s3] sm:$0xff] %vm199_vm1, %v183_v56  ;;  %208 = vst.msk [vmem:[%s454_s3 + $0x40] sm:$0xff] %vm199_vm1, %v191_v57  ;;  %v184_v62 = vmax.f32 %v124_v58, 0.0  ;;  %v192_v63 = vmax.f32 %v156_v59, 0.0 }
  0xf2   :  { %203 = vst.msk [vmem:[%s454_s3 + $0x18] sm:$0xff] %vm199_vm1, %v186_v60  ;;  %211 = vst.msk [vmem:[%s454_s3 + $0x58] sm:$0xff] %vm199_vm1, %v194_v61 }
  0xf3   :  { %201 = vst.msk [vmem:[%s454_s3 + $0x8] sm:$0xff] %vm199_vm1, %v184_v62  ;;  %209 = vst.msk [vmem:[%s454_s3 + $0x48] sm:$0xff] %vm199_vm1, %v192_v63  ;;  %v258_v0 = vpop.f32.mrb[4].mxu0  ;;  %v266_v1 = vpop.f32.mrb[4].mxu1 }
  0xf4   :  { %v145_v2 = vadd.f32 %v258_v0, %v220_v39  ;;  %v177_v3 = vadd.f32 %v266_v1, %v220_v39  ;;  %v136_v4 = vpop.f32.mrb[5].mxu0  ;;  %v168_v5 = vpop.f32.mrb[5].mxu1 }
  0xf5   :  { %v137_v6 = vadd.f32 %v220_v39, %v136_v4  ;;  %v169_v7 = vadd.f32 %v220_v39, %v168_v5  ;;  %v259_v8 = vpop.f32.mrb[6].mxu0  ;;  %v267_v9 = vpop.f32.mrb[6].mxu1 }
  0xf6   :  { %v189_v10 = vmax.f32 %v145_v2, 0.0  ;;  %v197_v11 = vmax.f32 %v177_v3, 0.0  ;;  %v148_v12 = vadd.f32 %v259_v8, %v220_v39  ;;  %v180_v13 = vadd.f32 %v267_v9, %v220_v39  ;;  %v139_v14 = vpop.f32.mrb[7].mxu0  ;;  %v171_v15 = vpop.f32.mrb[7].mxu1 }
  0xf7   :  { %v187_v16 = vmax.f32 %v137_v6, 0.0  ;;  %v195_v17 = vmax.f32 %v169_v7, 0.0  ;;  %v140_v18 = vadd.f32 %v220_v39, %v139_v14  ;;  %v172_v19 = vadd.f32 %v220_v39, %v171_v15 }
  0xf8   :  { %206 = vst.msk [vmem:[%s454_s3 + $0x30] sm:$0xff] %vm199_vm1, %v189_v10  ;;  %214 = vst.msk [vmem:[%s454_s3 + $0x70] sm:$0xff] %vm199_vm1, %v197_v11  ;;  %v190_v20 = vmax.f32 %v148_v12, 0.0  ;;  %v198_v21 = vmax.f32 %v180_v13, 0.0 }
  0xf9   :  { %204 = vst.msk [vmem:[%s454_s3 + $0x20] sm:$0xff] %vm199_vm1, %v187_v16  ;;  %212 = vst.msk [vmem:[%s454_s3 + $0x60] sm:$0xff] %vm199_vm1, %v195_v17  ;;  %v188_v22 = vmax.f32 %v140_v18, 0.0  ;;  %v196_v23 = vmax.f32 %v172_v19, 0.0 }
  0xfa   :  { %207 = vst.msk [vmem:[%s454_s3 + $0x38] sm:$0xff] %vm199_vm1, %v190_v20  ;;  %215 = vst.msk [vmem:[%s454_s3 + $0x78] sm:$0xff] %vm199_vm1, %v198_v21 }
  0xfb   :  { %205 = vst.msk [vmem:[%s454_s3 + $0x28] sm:$0xff] %vm199_vm1, %v188_v22  ;;  %213 = vst.msk [vmem:[%s454_s3 + $0x68] sm:$0xff] %vm199_vm1, %v196_v23 }

</bundles_post_ra>
